<compile_context>
chip_gen: v6e
topology: v6e:2x2x1
jax: 0.10.0
libtpu: 0.0.40
codegen_flags: <defaults>
</compile_context>

<pallas_src>
import jax
import jax.numpy as jnp
from jax.experimental import pallas as pl
from jax.experimental.pallas import tpu as pltpu

_LANE = 128
_SUBLANE = 32                         # multiple of 32 => full packed stores for f32/bf16/int8
_BIG_COLS = 16 * _LANE                # 2048-lane-wide blocks (unmasked vst)
_TARGET_BLOCK_BYTES = 2 * 1024 * 1024  # ~2 MiB/block; 4x resident (in+out double-buffered)
_SMALL_BYTES = 4 * 1024 * 1024        # <= 4 MiB: one full-array block is fine everywhere


def _identity_kernel(x_ref, o_ref):
    # Straight VMEM load + store; the HBM DMA in/out is the entire cost.
    o_ref[...] = x_ref[...]


def identity(x: jax.Array) -> jax.Array:
    """Pallas implementation of nn.Identity: bit-exact pass-through.

    NOTE: the truly optimal implementation is `return x` (no HBM traffic at
    all); the pallas_call below exists to demonstrate the aliased,
    bandwidth-bound copy kernel.
    """
    orig_shape = x.shape
    orig_dtype = x.dtype
    n = x.size
    if n == 0:
        return x

    itemsize = jnp.dtype(orig_dtype).itemsize

    if n * itemsize <= _SMALL_BYTES:
        # Small tensor: single block covering the (lane-padded) array.
        cols = _LANE
        block_rows = -(-n // _LANE)            # ceil(n / 128) rows, one block
    else:
        # Large tensor: wide lane-dense blocks of ~_TARGET_BLOCK_BYTES each.
        cols = _BIG_COLS
        block_rows = max(
            _SUBLANE,
            (_TARGET_BLOCK_BYTES // (cols * itemsize) // _SUBLANE) * _SUBLANE,
        )

    block_elems = block_rows * cols
    pad = (-n) % block_elems                   # pad so every block is full-size
    flat = x.reshape(-1)
    if pad:
        flat = jnp.pad(flat, (0, pad))
    n_pad = n + pad
    rows = n_pad // cols
    x2d = flat.reshape(rows, cols)
    grid = (rows // block_rows,)               # exact by construction

    out = pl.pallas_call(
        _identity_kernel,
        out_shape=jax.ShapeDtypeStruct((rows, cols), orig_dtype),
        grid_spec=pltpu.PrefetchScalarGridSpec(
            num_scalar_prefetch=0,
            grid=grid,
            in_specs=[pl.BlockSpec((block_rows, cols), lambda i: (i, 0))],
            out_specs=pl.BlockSpec((block_rows, cols), lambda i: (i, 0)),
        ),
        # Output aliases the input HBM buffer: no second allocation/write path.
        input_output_aliases={0: 0},
        # Pure memory traffic hint for XLA's scheduler.
        cost_estimate=pl.CostEstimate(
            flops=0,
            transcendentals=0,
            bytes_accessed=2 * n_pad * itemsize,
        ),
        compiler_params=pltpu.CompilerParams(
            dimension_semantics=("parallel",),   # lets v7x split the copy over both TCs
            vmem_limit_bytes=32 * 1024 * 1024,   # headroom on v5e; == default on v6e/v7x
        ),
    )(x2d)

    out = out.reshape(-1)
    if pad:
        out = out[:n]
    return out.reshape(orig_shape)


if __name__ == "__main__":
    key = jax.random.PRNGKey(0)
    # Small NCHW input consistent with typical conv-block usage of Identity.
    x = jax.random.normal(key, (2, 4, 16, 16), dtype=jnp.float32)

    y = identity(x)
    jax.block_until_ready(y)

    assert y.shape == x.shape, (y.shape, x.shape)
    assert y.dtype == x.dtype, (y.dtype, x.dtype)
    assert bool(jnp.all(y == x)), "Identity output mismatch"

    print("KERNEL_OK")
</pallas_src>

<mosaic_0001>
module attributes {stable_mosaic.version = 11 : i64} {
  func.func @_identity_kernel(%arg0: i32, %arg1: memref<16x128xf32, #tpu.memory_space<vmem>>, %arg2: memref<16x128xf32, #tpu.memory_space<vmem>>) attributes {dimension_semantics = [#tpu.dimension_semantics<parallel>], iteration_bounds = array<i64: 1>, scalar_prefetch = 0 : i64, scratch_operands = 0 : i64, tpu.core_type = #tpu.core_type<tc>, window_params = [{transform_indices = @transform_0, window_bounds = array<i64: 16, 128>}, {transform_indices = @transform_1, window_bounds = array<i64: 16, 128>}]} {
    %c0 = arith.constant 0 : index
    %c0_0 = arith.constant 0 : index
    %0 = vector.load %arg1[%c0, %c0_0] : memref<16x128xf32, #tpu.memory_space<vmem>>, vector<16x128xf32>
    %c0_1 = arith.constant 0 : index
    %c0_2 = arith.constant 0 : index
    %1 = vector.load %arg2[%c0_1, %c0_2] : memref<16x128xf32, #tpu.memory_space<vmem>>, vector<16x128xf32>
    tpu.vector_store %arg2[%c0_1, %c0_2], %0 {strides = array<i32>} : memref<16x128xf32, #tpu.memory_space<vmem>>, vector<16x128xf32>,
    return
  }
  func.func @transform_0(%arg0: i32) -> (i32, i32) {
    %c0_i32 = arith.constant 0 : i32
    %c0_i32_0 = arith.constant 0 : i32
    return %arg0, %c0_i32 : i32, i32
  }
  func.func @transform_1(%arg0: i32) -> (i32, i32) {
    %c0_i32 = arith.constant 0 : i32
    %c0_i32_0 = arith.constant 0 : i32
    return %arg0, %c0_i32 : i32, i32
  }
}

</mosaic_0001>

<bundles_post_ra>
// kernel: tpu_custom_call.1
= control target key start
LH: loop header
LB: loop body
LE: loop exit
PB: predicated region body
PF: predicated region fallthrough
CT: control target
= control target key end

     0   :  { %6 = vsyncpa [#allocation3], 0  ;;  %s112_s0 = inlined_call_operand.hbm [shape: f32[16,128], index: 0, kind: input, shape index: {}, may-alias: {0,1}]   ;;  %s113_s1 = inlined_call_operand.hbm [shape: f32[16,128], index: 1, kind: output, shape index: {}, may-alias: {0,1}]  }
   0x1   :  { %7 = vsyncpa [#allocation4], 0  ;;  %s92_s6 = smov [#allocation2]  }
   0x2   :  { %s13_s7 = sshll.u32 %s92_s6, 4  ;;  %s14_s7 = int_to_ptr.vmem [resolvable:$true] %s13_s7 }
   0x3   :  { %s56_s8 = scalar_lea.vmem %s14_s7, 256  ;;  %p61_p1 = scmp.lt.s32.totalorder %s14_s7, %s14_s7 }
   0x4   :  { %p57_p0 = scmp.ne.s32.totalorder %s14_s7, %s56_s8  ;;  %p62_p2 = scmp.lt.s32.totalorder %s56_s8, %s56_s8 }
   0x6   :  { %p63_p3 = por %p62_p2, %p61_p1 }
   0x8   :  { %p64_p4 = pnand %p63_p3, %p57_p0 }
   0xa   :  { %67 = shalt.err (!%p64_p4)
}
   0xb   :  { %s93_s9 = smov 128   ;;  %s94_s10 = smov 8  }
   0xc   :  { %19 = dma.hbm_to_vmem [thread:$0]  %s112_s0, 256, %s14_s7, [#allocation3], %s93_s9, %s93_s9, %s94_s10  }
   0xd   :  { %88 = dma.done.wait [#allocation3], 256  }
   0xe   :  { %89 = vsyncadd [#allocation3], 4294967040  ;;  %s95_s13 = smov [#allocation5]   ;;  %v23_v0 = vld [vmem:[#allocation2] sm:$0xff]  ;;  %v24_v1 = vld [vmem:[#allocation2 + $0x8] sm:$0xff] }
   0xf   :  { %s32_s14 = sshll.u32 %s95_s13, 4  ;;  %25 = vst [vmem:[#allocation5] sm:$0xff] %v23_v0  ;;  %26 = vst [vmem:[#allocation5 + $0x8] sm:$0xff] %v24_v1  ;;  %s33_s14 = int_to_ptr.vmem [resolvable:$true] %s32_s14 }
  0x10   :  { %s68_s15 = scalar_lea.vmem %s33_s14, 256  ;;  %p73_p6 = scmp.lt.s32.totalorder %s33_s14, %s33_s14 }
  0x11   :  { %p69_p5 = scmp.ne.s32.totalorder %s33_s14, %s68_s15  ;;  %p74_p7 = scmp.lt.s32.totalorder %s68_s15, %s68_s15 }
  0x13   :  { %p75_p8 = por %p74_p7, %p73_p6 }
  0x15   :  { %p76_p9 = pnand %p75_p8, %p69_p5 }
  0x17   :  { %79 = shalt.err (!%p76_p9)
}
  0x18   :  { %38 = dma.vmem_to_hbm [thread:$0]  %s33_s14, 256, %s113_s1, [#allocation4], %s93_s9, %s93_s9, %s94_s10  }
  0x19   :  { %90 = dma.done.wait [#allocation4], 256  }
  0x1a   :  { %91 = vsyncadd [#allocation4], 4294967040 }
  0x1b   :  { %42 = vsyncpa [#allocation3], 1 }
  0x1c   :  { %43 = vsyncpa [#allocation4], 1 }

</bundles_post_ra>
